<compile_context>
chip_gen: v7x
topology: tpu7x:2x2x1
jax: 0.10.0
libtpu: 0.0.40
codegen_flags: <defaults>
</compile_context>

<pallas_src>
import functools

import jax
import jax.numpy as jnp
from jax.experimental import pallas as pl
from jax.experimental.pallas import tpu as pltpu


def _sublane_multiple(dtype):
    # 8 for 4-byte, 16 for 2-byte, 32 for 1-byte dtypes.
    itemsize = jnp.dtype(dtype).itemsize
    return max(8, 32 // itemsize)


def _pick_tile(dim, align, cap, min_exact):
    """Pick a tile for `dim`: prefer a full-extent or exact aligned divisor
    (no masked boundary blocks); fall back to a ragged grid with an aligned
    cap-sized tile. Returns the tile size (grid uses pl.cdiv either way)."""
    if dim <= cap:
        return dim  # full-extent block: always legal, no masking
    best = 0
    if dim % align == 0:
        t = (cap // align) * align
        while t >= align:
            if dim % t == 0:
                best = t
                break
            t -= align
    if best >= min_exact:
        return best
    # Ragged fallback: only the last row/column of blocks gets masked stores.
    return (cap // align) * align


def _normalize_kernel(x_ref, scale_ref, bias_ref, o_ref):
    # x_ref:     (TR, TP) pixel tile
    # scale_ref: (TR, 1)  per-row 1/std   (f32, broadcast over lanes)
    # bias_ref:  (TR, 1)  per-row -mean/std
    o_ref[...] = (x_ref[...] * scale_ref[...] + bias_ref[...]).astype(o_ref.dtype)


@functools.partial(jax.jit, static_argnames=("max_tr", "max_tp"))
def normalization_forward(img, mean, std, *, max_tr=256, max_tp=4096):
    """(img - mean[:,None,None]) / std[:,None,None] for NCHW `img`.

    img:  (N, C, H, W)
    mean: (C,)
    std:  (C,)
    """
    N, C, H, W = img.shape
    R, P = N * C, H * W

    r_align = _sublane_multiple(img.dtype)

    # Tile sizes: sublane-aligned rows, lane-dense pixel tiles, exact divisors
    # preferred so there is no padding and no masked boundary blocks.
    TR = _pick_tile(R, r_align, max_tr, min_exact=max(r_align, 64))
    TP = _pick_tile(P, 128, max_tp, min_exact=1024)

    # v7x megacore: keep >=4 blocks when the array is big enough to split.
    while pl.cdiv(R, TR) * pl.cdiv(P, TP) < 4:
        if TP % (2 * 128) == 0 and TP // 2 >= 512:
            TP //= 2
        elif TR % (2 * r_align) == 0 and TR // 2 >= r_align:
            TR //= 2
        else:
            break

    grid = (pl.cdiv(R, TR), pl.cdiv(P, TP))

    # Flatten to a 2-D slab (bitcast-level reshape, no HBM copy).
    x2d = img.reshape(R, P)

    # Fold the divide into per-row scale/bias (C scalars -> tiny f32 arrays).
    inv_std = (1.0 / std).astype(jnp.float32)
    scale_rows = jnp.tile(inv_std, N).reshape(R, 1)
    bias_rows = jnp.tile((-mean.astype(jnp.float32) * inv_std), N).reshape(R, 1)

    # TODO(synk): optionally add input_output_aliases={0: 0} when the caller
    # can donate `img` to halve peak HBM footprint (traffic is unchanged).
    out2d = pl.pallas_call(
        _normalize_kernel,
        out_shape=jax.ShapeDtypeStruct((R, P), img.dtype),
        grid_spec=pltpu.PrefetchScalarGridSpec(
            num_scalar_prefetch=0,
            grid=grid,
            in_specs=[
                pl.BlockSpec((TR, TP), lambda i, j: (i, j)),
                pl.BlockSpec((TR, 1), lambda i, j: (i, 0)),
                pl.BlockSpec((TR, 1), lambda i, j: (i, 0)),
            ],
            out_specs=pl.BlockSpec((TR, TP), lambda i, j: (i, j)),
        ),
        compiler_params=pltpu.CompilerParams(
            dimension_semantics=("parallel", "parallel"),
            vmem_limit_bytes=32 << 20,
        ),
    )(x2d, scale_rows, bias_rows)

    return out2d.reshape(N, C, H, W)


if __name__ == "__main__":
    key = jax.random.PRNGKey(0)

    N, C, H, W = 2, 4, 16, 16
    img = jax.random.normal(key, (N, C, H, W), dtype=jnp.float32)

    # Deterministic "module parameters" (length-C mean/std, viewed (-1,1,1)).
    mean = jnp.array([0.485, 0.456, 0.406, 0.5], dtype=jnp.float32)
    std = jnp.array([0.229, 0.224, 0.225, 0.25], dtype=jnp.float32)

    out = normalization_forward(img, mean, std)
    out = jax.block_until_ready(out)

    # Reference check in plain JAX (same semantics as the PyTorch module).
    # Kernel uses x*(1/std) + (-mean/std), so allow a couple of ulps vs the
    # true division.
    ref = (img - mean[None, :, None, None]) / std[None, :, None, None]
    assert out.shape == img.shape
    assert jnp.allclose(out, ref, atol=1e-6, rtol=1e-5)

    print("KERNEL_OK")
</pallas_src>

<mosaic_0001>
module attributes {stable_mosaic.version = 11 : i64} {
  func.func @_normalize_kernel(%arg0: i32, %arg1: i32, %arg2: memref<8x256xf32, #tpu.memory_space<vmem>>, %arg3: memref<8x1xf32, #tpu.memory_space<vmem>>, %arg4: memref<8x1xf32, #tpu.memory_space<vmem>>, %arg5: memref<8x256xf32, #tpu.memory_space<vmem>>) attributes {dimension_semantics = [#tpu.dimension_semantics<parallel>, #tpu.dimension_semantics<parallel>], iteration_bounds = array<i64: 1, 1>, scalar_prefetch = 0 : i64, scratch_operands = 0 : i64, tpu.core_type = #tpu.core_type<tc>, window_params = [{transform_indices = @transform_0, window_bounds = array<i64: 8, 256>}, {transform_indices = @transform_1, window_bounds = array<i64: 8, 1>}, {transform_indices = @transform_2, window_bounds = array<i64: 8, 1>}, {transform_indices = @transform_3, window_bounds = array<i64: 8, 256>}]} {
    %c0 = arith.constant 0 : index
    %c0_0 = arith.constant 0 : index
    %0 = vector.load %arg2[%c0, %c0_0] : memref<8x256xf32, #tpu.memory_space<vmem>>, vector<8x256xf32>
    %c0_1 = arith.constant 0 : index
    %c0_2 = arith.constant 0 : index
    %1 = vector.load %arg3[%c0_1, %c0_2] : memref<8x1xf32, #tpu.memory_space<vmem>>, vector<8x1xf32>
    %2 = vector.broadcast %1 : vector<8x1xf32> to vector<8x256xf32>
    %3 = arith.mulf %0, %2 : vector<8x256xf32>
    %c0_3 = arith.constant 0 : index
    %c0_4 = arith.constant 0 : index
    %4 = vector.load %arg4[%c0_3, %c0_4] : memref<8x1xf32, #tpu.memory_space<vmem>>, vector<8x1xf32>
    %5 = vector.broadcast %4 : vector<8x1xf32> to vector<8x256xf32>
    %6 = arith.addf %3, %5 : vector<8x256xf32>
    %c0_5 = arith.constant 0 : index
    %c0_6 = arith.constant 0 : index
    %7 = vector.load %arg5[%c0_5, %c0_6] : memref<8x256xf32, #tpu.memory_space<vmem>>, vector<8x256xf32>
    tpu.vector_store %arg5[%c0_5, %c0_6], %6 {strides = array<i32>} : memref<8x256xf32, #tpu.memory_space<vmem>>, vector<8x256xf32>,
    return
  }
  func.func @transform_0(%arg0: i32, %arg1: i32) -> (i32, i32) {
    %c0_i32 = arith.constant 0 : i32
    return %arg0, %arg1 : i32, i32
  }
  func.func @transform_1(%arg0: i32, %arg1: i32) -> (i32, i32) {
    %c0_i32 = arith.constant 0 : i32
    %c0_i32_0 = arith.constant 0 : i32
    return %arg0, %c0_i32 : i32, i32
  }
  func.func @transform_2(%arg0: i32, %arg1: i32) -> (i32, i32) {
    %c0_i32 = arith.constant 0 : i32
    %c0_i32_0 = arith.constant 0 : i32
    return %arg0, %c0_i32 : i32, i32
  }
  func.func @transform_3(%arg0: i32, %arg1: i32) -> (i32, i32) {
    %c0_i32 = arith.constant 0 : i32
    return %arg0, %arg1 : i32, i32
  }
}

</mosaic_0001>

<bundles_post_ra>
// kernel: tile.18
= control target key start
LH: loop header
LB: loop body
LE: loop exit
PB: predicated region body
PF: predicated region fallthrough
CT: control target
= control target key end

     0   :  { %s22_s0 = inlined_call_operand.vmem [shape: f32[4], index: 0, kind: input, shape index: {}]   ;;  %s23_s1 = inlined_call_operand.vmem [shape: f32[2,4], index: 1, kind: output, shape index: {}]  }
   0x1   :  { %v4_v0 = vld [vmem:[%s22_s0] ss:$0 sm:$0xff] }
   0x2   :  { %5 = vst [vmem:[%s23_s1] sm:$0x3] %v4_v0 }

// kernel: tile.0
= control target key start
LH: loop header
LB: loop body
LE: loop exit
PB: predicated region body
PF: predicated region fallthrough
CT: control target
= control target key end

     0   :  { %s34_s8 = smov 125   ;;  %vm7_vm0 = vcmask 7168   ;;  %s35_s11 = smov 126   ;;  %s61_s0 = inlined_call_operand.vmem [shape: f32[2,4], index: 0, kind: input, shape index: {}]   ;;  %s62_s1 = inlined_call_operand.vmem [shape: f32[8,1], index: 1, kind: output, shape index: {}]  }
   0x1   :  { %v4_v0 = vld [vmem:[%s61_s0] sm:$0x3]  ;;  %s33_s0 = smov 127  }
   0x2   :  { %5 = vst [vmem:[#allocation0] sm:$0x3] %v4_v0 }
   0x9   :  { %v9_v1 = vld [vmem:[#allocation0] sm:$0x3]  }
   0xa   :  { %v21_v2 = vld [vmem:[#allocation0] sm:$0x3]   ;;  %10 = vrot.lane.b32.xlu0 %v9_v1, %s33_s0 }
   0xb   :  { %22 = vrot.lane.b32.xlu1 %v21_v2, %s34_s8  ;;  %v6_v3 = vld [vmem:[#allocation0] sm:$0x3]  }
   0xc   :  { %v15_v4 = vld [vmem:[#allocation0] sm:$0x3]   ;;  %8 = vst.msk [vmem:[%s62_s1] ss:$4 sm:$0x3] %vm7_vm0, %v6_v3  }
   0xe   :  { %16 = vrot.lane.b32.xlu0 %v15_v4, %s35_s11 }
  0x7c   :  { %v11_v5 = vpop.permute.xlu0 %10  }
  0x7d   :  { %v23_v6 = vpop.permute.xlu1 %22   ;;  %27 = vst.msk [vmem:[%s62_s1 + $0x1] ss:$4 sm:$0x3] %vm7_vm0, %v11_v5  }
  0x7e   :  { %29 = vst.msk [vmem:[%s62_s1 + $0x3] ss:$4 sm:$0x3] %vm7_vm0, %v23_v6  }
  0x80   :  { %v17_v7 = vpop.permute.xlu0 %16  }
  0x81   :  { %28 = vst.msk [vmem:[%s62_s1 + $0x2] ss:$4 sm:$0x3] %vm7_vm0, %v17_v7  }

// kernel: normalization_forward.1
= control target key start
LH: loop header
LB: loop body
LE: loop exit
PB: predicated region body
PF: predicated region fallthrough
CT: control target
= control target key end

     0   :  { %v40_v0 = vmov 0   ;;  %s79_s1 = inlined_call_operand.vmem [shape: f32[8,1], index: 1, kind: input, shape index: {}]   ;;  %s80_s2 = inlined_call_operand.vmem [shape: f32[8,1], index: 2, kind: input, shape index: {}]   ;;  %s81_s0 = inlined_call_operand.vmem [shape: f32[8,256], index: 0, kind: input, shape index: {}]   ;;  %s82_s3 = inlined_call_operand.vmem [shape: f32[8,256], index: 3, kind: output, shape index: {}]  }
   0x1   :  { %39 = vset.pattern.permute.xlu0 %v40_v0  ;;  %v16_v1 = vld [vmem:[%s79_s1] sm:$0xff]  ;;  %v15_v5 = vld [vmem:[%s81_s0 + $0x8] sm:$0xff] }
   0x2   :  { %19 = vperm.xlu0 %39, %v16_v1   ;;  %v24_v2 = vld [vmem:[%s80_s2] sm:$0xff] }
   0x3   :  { %v14_v4 = vld [vmem:[%s81_s0] sm:$0xff] }
   0x6   :  { %27 = vperm.xlu0 %39, %v24_v2  }
  0x81   :  { %v20_v3 = vpop.permute.xlu0 %19 }
  0x82   :  { %v22_v6 = vmul.f32 %v20_v3, %v14_v4  ;;  %v23_v7 = vmul.f32 %v20_v3, %v15_v5 }
  0x85   :  { %v28_v8 = vpop.permute.xlu0 %27 }
  0x86   :  { %v30_v9 = vadd.f32 %v28_v8, %v22_v6  ;;  %v31_v10 = vadd.f32 %v28_v8, %v23_v7 }
  0x88   :  { %32 = vst [vmem:[%s82_s3] sm:$0xff] %v30_v9  ;;  %33 = vst [vmem:[%s82_s3 + $0x8] sm:$0xff] %v31_v10 }

</bundles_post_ra>
